<compile_context>
chip_gen: v7x
topology: tpu7x:2x2x1
jax: 0.10.0
libtpu: 0.0.40
codegen_flags: <defaults>
</compile_context>

<pallas_src>
import jax
import jax.numpy as jnp
from jax import lax
from jax.experimental import pallas as pl
from jax.experimental.pallas import tpu as pltpu

BN_EPS = 1e-5
LANE = 128


def _round_up(x, m):
    return ((x + m - 1) // m) * m


def _pad2d(x, rows, cols):
    return jnp.pad(x, ((0, rows - x.shape[0]), (0, cols - x.shape[1])))


def _encoder_kernel(h0_ref, a_ref, w1_ref, w2_ref, bn1_ref, bn2_ref,
                    hout_ref, pool_ref):
    """One grid step == one GIN layer.

    hout_ref has a constant block index across the (arbitrary) layer axis, so it is
    resident in VMEM for the whole kernel and carries h from layer to layer; it is
    written back to HBM only once, at the end.
    """
    i = pl.program_id(0)

    # Layer 0: seed the resident node-feature buffer with the (padded) input features.
    @pl.when(i == 0)
    def _():
        hout_ref[...] = h0_ref[...]

    h = hout_ref[...]                                       # (N, RES) f32
    n = h.shape[0]
    inv_n = 1.0 / n

    # ---- GINConv aggregation: (A + I) @ h   (bf16 MXU inputs, f32 accumulation) ----
    agg = jnp.dot(a_ref[...], h.astype(jnp.bfloat16),
                  preferred_element_type=jnp.float32)       # (N, RES) f32

    # ---- MLP linear 1 (no bias) ----
    z1 = jnp.dot(agg.astype(jnp.bfloat16), w1_ref[0],
                 preferred_element_type=jnp.float32)        # (N, OHP) f32

    # ---- MLP BatchNorm1d (batch stats over nodes) + ReLU, folded affine ----
    # (column reductions stay on the XLU in f32: negligible at N=16, and keeps the
    #  statistics bit-accurate vs. the f32 reference path)
    bn1 = bn1_ref[0]                                        # (2, OHP): [gamma; beta]
    mean1 = jnp.sum(z1, axis=0, keepdims=True) * inv_n
    zc1 = z1 - mean1
    var1 = jnp.sum(zc1 * zc1, axis=0, keepdims=True) * inv_n
    scale1 = bn1[0:1, :] * lax.rsqrt(var1 + BN_EPS)
    z1 = jnp.maximum(zc1 * scale1 + bn1[1:2, :], 0.0)

    # ---- MLP linear 2 (no bias) ----
    z2 = jnp.dot(z1.astype(jnp.bfloat16), w2_ref[0],
                 preferred_element_type=jnp.float32)        # (N, RES) f32

    # ---- Encoder BatchNorm(hidden) + ReLU, folded affine ----
    bn2 = bn2_ref[0]                                        # (2, RES): [gamma; beta]
    mean2 = jnp.sum(z2, axis=0, keepdims=True) * inv_n
    zc2 = z2 - mean2
    var2 = jnp.sum(zc2 * zc2, axis=0, keepdims=True) * inv_n
    scale2 = bn2[0:1, :] * lax.rsqrt(var2 + BN_EPS)
    h_new = jnp.maximum(zc2 * scale2 + bn2[1:2, :], 0.0)    # (N, RES)

    # Keep h resident for the next layer; lane-dense (128-wide) stores.
    hout_ref[...] = h_new
    # ---- SumPooling over nodes (single graph) ----
    pool_ref[...] = jnp.sum(h_new, axis=0).reshape(1, 1, -1)


def encoder1_forward(a_hat, h0, params):
    """Fused forward pass. params: list of (w1, w2, g1, b1, g2, b2) per layer,
    weights stored as (in_features, out_features)."""
    n, in_hidden = h0.shape
    assert n != 1, "h has a single node; batch_norm cannot normalize"
    num_layers = len(params)
    out_hidden = params[0][0].shape[1]
    hidden = params[0][1].shape[1]

    res = _round_up(max(in_hidden, hidden), LANE)   # lane-dense width of the node features
    ohp = _round_up(out_hidden, LANE)               # lane-dense width of the MLP hidden dim

    # Stack + zero-pad the per-layer parameters so a single kernel handles every layer.
    # Padded weight rows/cols and padded BN gamma/beta are zero, so padded feature
    # columns stay exactly zero through every layer.
    w1_s = jnp.stack([_pad2d(w1, res, ohp) for (w1, _, _, _, _, _) in params]
                     ).astype(jnp.bfloat16)                                  # (L, RES, OHP)
    w2_s = jnp.stack([_pad2d(w2, ohp, res) for (_, w2, _, _, _, _) in params]
                     ).astype(jnp.bfloat16)                                  # (L, OHP, RES)
    bn1_s = jnp.stack([jnp.stack([jnp.pad(g1.reshape(-1), (0, ohp - out_hidden)),
                                  jnp.pad(b1.reshape(-1), (0, ohp - out_hidden))])
                       for (_, _, g1, b1, _, _) in params]).astype(jnp.float32)  # (L, 2, OHP)
    bn2_s = jnp.stack([jnp.stack([jnp.pad(g2.reshape(-1), (0, res - hidden)),
                                  jnp.pad(b2.reshape(-1), (0, res - hidden))])
                       for (_, _, _, _, g2, b2) in params]).astype(jnp.float32)  # (L, 2, RES)

    h0_p = _pad2d(h0.astype(jnp.float32), n, res)                             # (N, RES)
    a_bf = a_hat.astype(jnp.bfloat16)       # entries are exactly 0/1 -> lossless, half the DMA

    h_pad, pooled = pl.pallas_call(
        _encoder_kernel,
        out_shape=(
            jax.ShapeDtypeStruct((n, res), jnp.float32),              # final h (padded)
            jax.ShapeDtypeStruct((num_layers, 1, res), jnp.float32),  # per-layer pooled rows
        ),
        grid=(num_layers,),
        in_specs=[
            pl.BlockSpec((n, res), lambda i: (0, 0)),          # h0: fetched once
            pl.BlockSpec((n, n), lambda i: (0, 0)),            # A_hat: fetched once
            pl.BlockSpec((1, res, ohp), lambda i: (i, 0, 0)),  # W1[i] (pipelined)
            pl.BlockSpec((1, ohp, res), lambda i: (i, 0, 0)),  # W2[i]
            pl.BlockSpec((1, 2, ohp), lambda i: (i, 0, 0)),    # BN1 gamma/beta[i]
            pl.BlockSpec((1, 2, res), lambda i: (i, 0, 0)),    # BN2 gamma/beta[i]
        ],
        out_specs=(
            pl.BlockSpec((n, res), lambda i: (0, 0)),          # resident h accumulator
            pl.BlockSpec((1, 1, res), lambda i: (i, 0, 0)),    # pooled row per layer
        ),
        compiler_params=pltpu.CompilerParams(
            dimension_semantics=("arbitrary",)),               # layers are sequential
    )(h0_p, a_bf, w1_s, w2_s, bn1_s, bn2_s)

    h_final = h_pad[:, :hidden]
    pooled_cat = pooled[:, 0, :hidden].reshape(1, num_layers * hidden)
    return h_final, pooled_cat


def init_encoder_params(key, in_hidden, out_hidden, hidden, num_layers):
    params = []
    for layer in range(num_layers):
        d_in = in_hidden if layer == 0 else hidden
        key, k1, k2 = jax.random.split(key, 3)
        bound1 = 1.0 / jnp.sqrt(d_in)
        bound2 = 1.0 / jnp.sqrt(out_hidden)
        w1 = jax.random.uniform(k1, (d_in, out_hidden), jnp.float32, -bound1, bound1)
        w2 = jax.random.uniform(k2, (out_hidden, hidden), jnp.float32, -bound2, bound2)
        g1 = jnp.ones((1, out_hidden), jnp.float32)   # MLP BatchNorm1d gamma
        b1 = jnp.zeros((1, out_hidden), jnp.float32)  # MLP BatchNorm1d beta
        g2 = jnp.ones((1, hidden), jnp.float32)       # Encoder BatchNorm gamma
        b2 = jnp.zeros((1, hidden), jnp.float32)      # Encoder BatchNorm beta
        params.append((w1, w2, g1, b1, g2, b2))
    return params


def _reference_forward(a_hat, h, params, matmul_dtype=jnp.float32):
    """Pure-JAX reference. With matmul_dtype=bf16 it mirrors the kernel's MXU numerics;
    with f32 it is the exact PyTorch training-mode semantics."""
    def mm(x, w):
        return jnp.dot(x.astype(matmul_dtype), w.astype(matmul_dtype),
                       preferred_element_type=jnp.float32)

    pooled_all = []
    for (w1, w2, g1, b1, g2, b2) in params:
        z1 = mm(mm(a_hat, h), w1)
        m1 = z1.mean(0, keepdims=True)
        zc1 = z1 - m1
        v1 = (zc1 * zc1).mean(0, keepdims=True)
        z1 = jnp.maximum(zc1 * (g1 * lax.rsqrt(v1 + BN_EPS)) + b1, 0.0)
        z2 = mm(z1, w2)
        m2 = z2.mean(0, keepdims=True)
        zc2 = z2 - m2
        v2 = (zc2 * zc2).mean(0, keepdims=True)
        h = jnp.maximum(zc2 * (g2 * lax.rsqrt(v2 + BN_EPS)) + b2, 0.0)
        pooled_all.append(h.sum(0, keepdims=True))
    return h, jnp.concatenate(pooled_all, axis=1)


if __name__ == "__main__":
    N = 16            # number of nodes
    in_hidden = 8     # input feature dim
    out_hidden = 32   # MLP hidden dim
    hidden = 16       # layer output dim
    num_layers = 2

    key = jax.random.PRNGKey(0)
    k_adj, k_feat, k_par = jax.random.split(key, 3)

    # Dense random graph (no self loops), then A_hat = A + I for GIN (eps = 0).
    adj = (jax.random.uniform(k_adj, (N, N)) < 0.3).astype(jnp.float32)
    adj = adj * (1.0 - jnp.eye(N, dtype=jnp.float32))
    a_hat = adj + jnp.eye(N, dtype=jnp.float32)

    h0 = jax.random.normal(k_feat, (N, in_hidden), jnp.float32)
    params = init_encoder_params(k_par, in_hidden, out_hidden, hidden, num_layers)

    h_final, pooled_cat = encoder1_forward(a_hat, h0, params)
    jax.block_until_ready((h_final, pooled_cat))

    assert h_final.shape == (N, hidden)
    assert pooled_cat.shape == (1, num_layers * hidden)

    # Tight check against a reference that mirrors the kernel's bf16-MXU / f32-accum numerics.
    h_bf, p_bf = _reference_forward(a_hat, h0, params, matmul_dtype=jnp.bfloat16)
    assert jnp.allclose(h_final, h_bf, atol=2e-3, rtol=2e-3)
    assert jnp.allclose(pooled_cat, p_bf, atol=2e-3, rtol=2e-3)

    # Loose sanity check against the exact f32 (PyTorch) semantics.
    h_f32, p_f32 = _reference_forward(a_hat, h0, params, matmul_dtype=jnp.float32)
    assert jnp.allclose(h_final, h_f32, atol=1e-1, rtol=1e-1)
    assert jnp.allclose(pooled_cat, p_f32, atol=1e-1, rtol=1e-1)

    print("KERNEL_OK")
</pallas_src>

<mosaic_0001>
module attributes {stable_mosaic.version = 11 : i64} {
  func.func @_encoder_kernel(%arg0: i32, %arg1: memref<16x128xf32, #tpu.memory_space<vmem>>, %arg2: memref<16x16xbf16, #tpu.memory_space<vmem>>, %arg3: memref<1x128x128xbf16, #tpu.memory_space<vmem>>, %arg4: memref<1x128x128xbf16, #tpu.memory_space<vmem>>, %arg5: memref<1x2x128xf32, #tpu.memory_space<vmem>>, %arg6: memref<1x2x128xf32, #tpu.memory_space<vmem>>, %arg7: memref<16x128xf32, #tpu.memory_space<vmem>>, %arg8: memref<1x1x128xf32, #tpu.memory_space<vmem>>) attributes {dimension_semantics = [#tpu.dimension_semantics<arbitrary>], iteration_bounds = array<i64: 2>, scalar_prefetch = 0 : i64, scratch_operands = 0 : i64, tpu.core_type = #tpu.core_type<tc>, window_params = [{pipeline_mode = #tpu.pipeline_mode<synchronous>, transform_indices = @transform_0, window_bounds = array<i64: 16, 128>}, {pipeline_mode = #tpu.pipeline_mode<synchronous>, transform_indices = @transform_1, window_bounds = array<i64: 16, 16>}, {transform_indices = @transform_2, window_bounds = array<i64: 1, 128, 128>}, {transform_indices = @transform_3, window_bounds = array<i64: 1, 128, 128>}, {transform_indices = @transform_4, window_bounds = array<i64: 1, 2, 128>}, {transform_indices = @transform_5, window_bounds = array<i64: 1, 2, 128>}, {pipeline_mode = #tpu.pipeline_mode<synchronous>, transform_indices = @transform_6, window_bounds = array<i64: 16, 128>}, {transform_indices = @transform_7, window_bounds = array<i64: 1, 1, 128>}]} {
    %c0_i32 = arith.constant 0 : i32
    %0 = arith.cmpi eq, %arg0, %c0_i32 : i32
    %1 = arith.extui %0 : i1 to i32
    %c0_i32_0 = arith.constant 0 : i32
    %2 = arith.cmpi ne, %1, %c0_i32_0 : i32
    scf.if %2 {
      %c0_36 = arith.constant 0 : index
      %c0_37 = arith.constant 0 : index
      %69 = vector.load %arg1[%c0_36, %c0_37] : memref<16x128xf32, #tpu.memory_space<vmem>>, vector<16x128xf32>
      %c0_38 = arith.constant 0 : index
      %c0_39 = arith.constant 0 : index
      %70 = vector.load %arg7[%c0_38, %c0_39] : memref<16x128xf32, #tpu.memory_space<vmem>>, vector<16x128xf32>
      tpu.vector_store %arg7[%c0_38, %c0_39], %69 {strides = array<i32>} : memref<16x128xf32, #tpu.memory_space<vmem>>, vector<16x128xf32>,
    } else {
    }
    %c0 = arith.constant 0 : index
    %c0_1 = arith.constant 0 : index
    %3 = vector.load %arg7[%c0, %c0_1] : memref<16x128xf32, #tpu.memory_space<vmem>>, vector<16x128xf32>
    %c0_2 = arith.constant 0 : index
    %c0_3 = arith.constant 0 : index
    %4 = vector.load %arg2[%c0_2, %c0_3] : memref<16x16xbf16, #tpu.memory_space<vmem>>, vector<16x16xbf16>
    %5 = arith.truncf %3 : vector<16x128xf32> to vector<16x128xbf16>
    %cst = arith.constant dense<0.000000e+00> : vector<16x128xf32>
    %6 = tpu.matmul %4, %5, %cst {dimension_numbers = #tpu.dot_dimension_numbers<[1], [0], [0], [1], [0, 0, 1, 1], [], []>} : vector<16x16xbf16>, vector<16x128xbf16>, vector<16x128xf32> -> vector<16x128xf32>
    %7 = arith.truncf %6 : vector<16x128xf32> to vector<16x128xbf16>
    %c0_4 = arith.constant 0 : index
    %c0_5 = arith.constant 0 : index
    %c0_6 = arith.constant 0 : index
    %8 = vector.load %arg3[%c0_4, %c0_5, %c0_6] : memref<1x128x128xbf16, #tpu.memory_space<vmem>>, vector<1x128x128xbf16>
    %9 = vector.shape_cast %8 : vector<1x128x128xbf16> to vector<128x128xbf16>
    %cst_7 = arith.constant dense<0.000000e+00> : vector<16x128xf32>
    %10 = tpu.matmul %7, %9, %cst_7 {dimension_numbers = #tpu.dot_dimension_numbers<[1], [0], [0], [1], [0, 0, 1, 1], [], []>} : vector<16x128xbf16>, vector<128x128xbf16>, vector<16x128xf32> -> vector<16x128xf32>
    %c0_8 = arith.constant 0 : index
    %c0_9 = arith.constant 0 : index
    %c0_10 = arith.constant 0 : index
    %11 = vector.load %arg5[%c0_8, %c0_9, %c0_10] : memref<1x2x128xf32, #tpu.memory_space<vmem>>, vector<1x2x128xf32>
    %12 = vector.shape_cast %11 : vector<1x2x128xf32> to vector<2x128xf32>
    %cst_11 = arith.constant dense<0.000000e+00> : vector<128xf32>
    %13 = vector.multi_reduction <add>, %10, %cst_11 [0] : vector<16x128xf32> to vector<128xf32>
    %14 = vector.shape_cast %13 : vector<128xf32> to vector<1x128xf32>
    %cst_12 = arith.constant 6.250000e-02 : f32
    %15 = vector.broadcast %cst_12 : f32 to vector<1x128xf32>
    %16 = arith.mulf %14, %15 : vector<1x128xf32>
    %17 = vector.broadcast %16 : vector<1x128xf32> to vector<16x128xf32>
    %18 = arith.subf %10, %17 : vector<16x128xf32>
    %19 = arith.mulf %18, %18 : vector<16x128xf32>
    %cst_13 = arith.constant dense<0.000000e+00> : vector<128xf32>
    %20 = vector.multi_reduction <add>, %19, %cst_13 [0] : vector<16x128xf32> to vector<128xf32>
    %21 = vector.shape_cast %20 : vector<128xf32> to vector<1x128xf32>
    %cst_14 = arith.constant 6.250000e-02 : f32
    %22 = vector.broadcast %cst_14 : f32 to vector<1x128xf32>
    %23 = arith.mulf %21, %22 : vector<1x128xf32>
    %24 = vector.extract_strided_slice %12 {offsets = [0, 0], sizes = [1, 128], strides = [1, 1]} : vector<2x128xf32> to vector<1x128xf32>
    %cst_15 = arith.constant 9.99999974E-6 : f32
    %25 = vector.broadcast %cst_15 : f32 to vector<1x128xf32>
    %26 = arith.addf %23, %25 : vector<1x128xf32>
    %27 = math.rsqrt %26 : vector<1x128xf32>
    %28 = arith.mulf %24, %27 : vector<1x128xf32>
    %29 = vector.broadcast %28 : vector<1x128xf32> to vector<16x128xf32>
    %30 = arith.mulf %18, %29 : vector<16x128xf32>
    %31 = vector.extract_strided_slice %12 {offsets = [1, 0], sizes = [1, 128], strides = [1, 1]} : vector<2x128xf32> to vector<1x128xf32>
    %32 = vector.broadcast %31 : vector<1x128xf32> to vector<16x128xf32>
    %33 = arith.addf %30, %32 : vector<16x128xf32>
    %cst_16 = arith.constant 0.000000e+00 : f32
    %34 = vector.broadcast %cst_16 : f32 to vector<16x128xf32>
    %35 = arith.maximumf %33, %34 : vector<16x128xf32>
    %36 = arith.truncf %35 : vector<16x128xf32> to vector<16x128xbf16>
    %c0_17 = arith.constant 0 : index
    %c0_18 = arith.constant 0 : index
    %c0_19 = arith.constant 0 : index
    %37 = vector.load %arg4[%c0_17, %c0_18, %c0_19] : memref<1x128x128xbf16, #tpu.memory_space<vmem>>, vector<1x128x128xbf16>
    %38 = vector.shape_cast %37 : vector<1x128x128xbf16> to vector<128x128xbf16>
    %cst_20 = arith.constant dense<0.000000e+00> : vector<16x128xf32>
    %39 = tpu.matmul %36, %38, %cst_20 {dimension_numbers = #tpu.dot_dimension_numbers<[1], [0], [0], [1], [0, 0, 1, 1], [], []>} : vector<16x128xbf16>, vector<128x128xbf16>, vector<16x128xf32> -> vector<16x128xf32>
    %c0_21 = arith.constant 0 : index
    %c0_22 = arith.constant 0 : index
    %c0_23 = arith.constant 0 : index
    %40 = vector.load %arg6[%c0_21, %c0_22, %c0_23] : memref<1x2x128xf32, #tpu.memory_space<vmem>>, vector<1x2x128xf32>
    %41 = vector.shape_cast %40 : vector<1x2x128xf32> to vector<2x128xf32>
    %cst_24 = arith.constant dense<0.000000e+00> : vector<128xf32>
    %42 = vector.multi_reduction <add>, %39, %cst_24 [0] : vector<16x128xf32> to vector<128xf32>
    %43 = vector.shape_cast %42 : vector<128xf32> to vector<1x128xf32>
    %cst_25 = arith.constant 6.250000e-02 : f32
    %44 = vector.broadcast %cst_25 : f32 to vector<1x128xf32>
    %45 = arith.mulf %43, %44 : vector<1x128xf32>
    %46 = vector.broadcast %45 : vector<1x128xf32> to vector<16x128xf32>
    %47 = arith.subf %39, %46 : vector<16x128xf32>
    %48 = arith.mulf %47, %47 : vector<16x128xf32>
    %cst_26 = arith.constant dense<0.000000e+00> : vector<128xf32>
    %49 = vector.multi_reduction <add>, %48, %cst_26 [0] : vector<16x128xf32> to vector<128xf32>
    %50 = vector.shape_cast %49 : vector<128xf32> to vector<1x128xf32>
    %cst_27 = arith.constant 6.250000e-02 : f32
    %51 = vector.broadcast %cst_27 : f32 to vector<1x128xf32>
    %52 = arith.mulf %50, %51 : vector<1x128xf32>
    %53 = vector.extract_strided_slice %41 {offsets = [0, 0], sizes = [1, 128], strides = [1, 1]} : vector<2x128xf32> to vector<1x128xf32>
    %cst_28 = arith.constant 9.99999974E-6 : f32
    %54 = vector.broadcast %cst_28 : f32 to vector<1x128xf32>
    %55 = arith.addf %52, %54 : vector<1x128xf32>
    %56 = math.rsqrt %55 : vector<1x128xf32>
    %57 = arith.mulf %53, %56 : vector<1x128xf32>
    %58 = vector.broadcast %57 : vector<1x128xf32> to vector<16x128xf32>
    %59 = arith.mulf %47, %58 : vector<16x128xf32>
    %60 = vector.extract_strided_slice %41 {offsets = [1, 0], sizes = [1, 128], strides = [1, 1]} : vector<2x128xf32> to vector<1x128xf32>
    %61 = vector.broadcast %60 : vector<1x128xf32> to vector<16x128xf32>
    %62 = arith.addf %59, %61 : vector<16x128xf32>
    %cst_29 = arith.constant 0.000000e+00 : f32
    %63 = vector.broadcast %cst_29 : f32 to vector<16x128xf32>
    %64 = arith.maximumf %62, %63 : vector<16x128xf32>
    %c0_30 = arith.constant 0 : index
    %c0_31 = arith.constant 0 : index
    %65 = vector.load %arg7[%c0_30, %c0_31] : memref<16x128xf32, #tpu.memory_space<vmem>>, vector<16x128xf32>
    tpu.vector_store %arg7[%c0_30, %c0_31], %64 {strides = array<i32>} : memref<16x128xf32, #tpu.memory_space<vmem>>, vector<16x128xf32>,
    %cst_32 = arith.constant dense<0.000000e+00> : vector<128xf32>
    %66 = vector.multi_reduction <add>, %64, %cst_32 [0] : vector<16x128xf32> to vector<128xf32>
    %67 = vector.shape_cast %66 : vector<128xf32> to vector<1x1x128xf32>
    %c0_33 = arith.constant 0 : index
    %c0_34 = arith.constant 0 : index
    %c0_35 = arith.constant 0 : index
    %68 = vector.load %arg8[%c0_33, %c0_34, %c0_35] : memref<1x1x128xf32, #tpu.memory_space<vmem>>, vector<1x1x128xf32>
    tpu.vector_store %arg8[%c0_33, %c0_34, %c0_35], %67 {strides = array<i32>} : memref<1x1x128xf32, #tpu.memory_space<vmem>>, vector<1x1x128xf32>,
    return
  }
  func.func @transform_0(%arg0: i32) -> (i32, i32) {
    %c0_i32 = arith.constant 0 : i32
    %c0_i32_0 = arith.constant 0 : i32
    %c0_i32_1 = arith.constant 0 : i32
    return %c0_i32, %c0_i32_0 : i32, i32
  }
  func.func @transform_1(%arg0: i32) -> (i32, i32) {
    %c0_i32 = arith.constant 0 : i32
    %c0_i32_0 = arith.constant 0 : i32
    %c0_i32_1 = arith.constant 0 : i32
    return %c0_i32, %c0_i32_0 : i32, i32
  }
  func.func @transform_2(%arg0: i32) -> (i32, i32, i32) {
    %c0_i32 = arith.constant 0 : i32
    %c0_i32_0 = arith.constant 0 : i32
    %c0_i32_1 = arith.constant 0 : i32
    return %arg0, %c0_i32, %c0_i32_0 : i32, i32, i32
  }
  func.func @transform_3(%arg0: i32) -> (i32, i32, i32) {
    %c0_i32 = arith.constant 0 : i32
    %c0_i32_0 = arith.constant 0 : i32
    %c0_i32_1 = arith.constant 0 : i32
    return %arg0, %c0_i32, %c0_i32_0 : i32, i32, i32
  }
  func.func @transform_4(%arg0: i32) -> (i32, i32, i32) {
    %c0_i32 = arith.constant 0 : i32
    %c0_i32_0 = arith.constant 0 : i32
    %c0_i32_1 = arith.constant 0 : i32
    return %arg0, %c0_i32, %c0_i32_0 : i32, i32, i32
  }
  func.func @transform_5(%arg0: i32) -> (i32, i32, i32) {
    %c0_i32 = arith.constant 0 : i32
    %c0_i32_0 = arith.constant 0 : i32
    %c0_i32_1 = arith.constant 0 : i32
    return %arg0, %c0_i32, %c0_i32_0 : i32, i32, i32
  }
  func.func @transform_6(%arg0: i32) -> (i32, i32) {
    %c0_i32 = arith.constant 0 : i32
    %c0_i32_0 = arith.constant 0 : i32
    %c0_i32_1 = arith.constant 0 : i32
    return %c0_i32, %c0_i32_0 : i32, i32
  }
  func.func @transform_7(%arg0: i32) -> (i32, i32, i32) {
    %c0_i32 = arith.constant 0 : i32
    %c0_i32_0 = arith.constant 0 : i32
    %c0_i32_1 = arith.constant 0 : i32
    return %arg0, %c0_i32, %c0_i32_0 : i32, i32, i32
  }
}

</mosaic_0001>

<bundles_post_ra>
// kernel: tpu_custom_call.1
= control target key start
LH: loop header
LB: loop body
LE: loop exit
PB: predicated region body
PF: predicated region fallthrough
CT: control target
= control target key end

     0   :  { %s1760_s0 = inlined_call_operand.hbm [shape: f32[16,128], index: 0, kind: input, shape index: {}]   ;;  %s1761_s1 = inlined_call_operand.hbm [shape: bf16[16,16], index: 1, kind: input, shape index: {}]   ;;  %s1762_s2 = inlined_call_operand.hbm [shape: bf16[2,128,128], index: 2, kind: input, shape index: {}]   ;;  %s1763_s3 = inlined_call_operand.hbm [shape: bf16[2,128,128], index: 3, kind: input, shape index: {}]   ;;  %s1764_s4 = inlined_call_operand.vmem [shape: f32[2,2,128], index: 4, kind: input, shape index: {}]   ;;  %s1765_s5 = inlined_call_operand.vmem [shape: f32[2,2,128], index: 5, kind: input, shape index: {}]   ;;  %s1766_s6 = inlined_call_operand.hbm [shape: f32[16,128], index: 6, kind: output, shape index: {0}]   ;;  %s1767_s7 = inlined_call_operand.hbm [shape: f32[2,1,128], index: 7, kind: output, shape index: {1}]  }
   0x1   :  { %1783 = sst [smem:[#allocation22_spill]] %s1760_s0 }
   0x2   :  { %1784 = sst [smem:[#allocation23_spill]] %s1762_s2 }
   0x3   :  { %13 = vsyncpa [#allocation3], 0 }
   0x4   :  { %14 = vsyncpa [#allocation6], 0 }
   0x5   :  { %15 = vsyncpa [#allocation4], 0 }
   0x6   :  { %16 = vsyncpa [#allocation11], 0 }
   0x7   :  { %18 = vsyncpa [#allocation11 + $0x1], 0  ;;  %s1417_s24 = smov 0   ;;  %s1419_s25 = smov 0  }
   0x8   :  { %s1421_s26 = smov 0   ;;  %s1423_s27 = smov 0  }
   0x9 LB: > { %1785 = sst [smem:[#allocation17_spill]] %s1349_s24  ;;  %s1438_s28 = sadd.s32 4294967295, %s1361_s27   ;;  %s1361_s27 = sphi %s1423_s27, %s1824_s27   ;;  %s1357_s26 = sphi %s1421_s26, %s1826_s26   ;;  %s1353_s25 = sphi %s1419_s25, %s1828_s25   ;;  %s1349_s24 = sphi %s1417_s24, %s1827_s24  }
   0xa   : > { %1786 = sst [smem:[#allocation18_spill]] %s1357_s26  ;;  %s923_s29 = sadd.s32 4294967294, %s1361_s27  }
   0xb   : > { %s1442_s30 = sadd.s32 1, %s1361_s27   ;;  %s73_s8 = sadd.s32 1, %s1357_s26 }
   0xc   : > { %1787 = sst [smem:[#allocation19_spill]] %s1442_s30  ;;  %s70_s9 = ssub.s32 %s1361_s27, %s1442_s30 }
   0xd   : > { %p80_p0 = scmp.ne.s32.totalorder %s1357_s26, %s1353_s25  ;;  %p71_p1 = scmp.eq.s32.totalorder %s70_s9, 0 }
   0xe   : > { %p81_p2 = scmp.eq.s32.totalorder %s1361_s27, 0  ;;  %p86_p3 = scmp.ne.s32.totalorder %s1353_s25, %s1349_s24 }
   0xf   : > { %p1769_p4 = scmp.eq.s32.totalorder %s1438_s28, 0  ;;  %p1768_p7 = scmp.eq.s32.totalorder %s1438_s28, 1 }
  0x10   : > { %s1454_s10 = scalar_select %p71_p1, %s1357_s26, %s73_s8  }
  0x11   : > { %p1456_p5 = por %p81_p2, %p80_p0  ;;  %p1462_p6 = por %p1769_p4, %p86_p3 }
  0x12   : > { %1788 = sst [smem:[#allocation20_spill]] %s1454_s10  ;;  %p215_p8 = scmp.eq.s32.totalorder %s923_s29, 1 }
  0x13   : > { %s1789_s11 = scalar_select %p1456_p5, 1, 0 }
  0x14   : > { %s1790_s12 = scalar_select %p1462_p6, 1, 0 }
  0x15   : > { %p924_p9 = scmp.ge.s32.totalorder %s1361_s27, 1  ;;  %p222_p10 = scmp.lt.s32.totalorder %s1361_s27, 3 }
  0x16   : > { %p1471_p11 = por %p1768_p7, %p80_p0  ;;  %p1475_p12 = por %p215_p8, %p86_p3 }
  0x17   : > { %p1479_p13 = pnand %p924_p9, %p222_p10  ;;  %s1363_s16 = smov [#allocation2]  }
  0x18   : > { %s1791_s13 = scalar_select %p1471_p11, 1, 0 }
  0x19   : > { %s1792_s14 = scalar_select %p1475_p12, 1, 0 }
  0x1a   : > { %s1794_s15 = scalar_select %p1479_p13, 1, 0 }
  0x1b   : > { %1793 = sst [smem:[#allocation21_spill]] %s1792_s14  ;;  %p1051_p2 = pneg %p1479_p13 }
  0x1c   : > { %s234_s17 = sshll.u32 %s1363_s16, 4  ;;  %s1796_s0 = sld [smem:[#allocation22_spill]]  ;;  %s235_s17 = int_to_ptr.vmem [resolvable:$true] %s234_s17 }
  0x1d   : > { %p1488_p0 = pnand %p1051_p2, %p1769_p4 }
  0x1f   : > { %p1776_p10 = pneg %p1488_p0 }
  0x22   : > { %s1141_s21 = scalar_lea.hbm %s1796_s0, 256 }
  0x23   : > { %p1142_p9 = scmp.ne.s32.totalorder %s1796_s0, %s1141_s21  ;;  %p1148_p1 = scmp.lt.u32.totalorder %s1141_s21, %s1796_s0 }
  0x25   : > { %p1144_p2 = pnand %p1776_p10, %p1142_p9 }
  0x27   : > { %p1145_p7 = pneg %p1144_p2 }
  0x29   : > { %p1150_p3 = pnand %p1148_p1, %p1145_p7 }
  0x2b   : > { %1153 = shalt.err (!%p1150_p3)
}
  0x2c   : > { %s1154_s9 = scalar_lea.vmem %s235_s17, 256  ;;  %p1162_p11 = scmp.lt.s32.totalorder %s235_s17, %s235_s17 }
  0x2d   : > { %p1155_p4 = scmp.ne.s32.totalorder %s235_s17, %s1154_s9  ;;  %p1163_p6 = scmp.lt.s32.totalorder %s1154_s9, %s1154_s9 }
  0x2f   : > { %p1157_p8 = pnand %p1155_p4, %p1776_p10  ;;  %p1164_p13 = por %p1163_p6, %p1162_p11 }
  0x31   : > { %p1158_p12 = pneg %p1157_p8 }
  0x33   : > { %p1165_p5 = pnand %p1164_p13, %p1158_p12 }
  0x35   : > { %1168 = shalt.err (!%p1165_p5)
}
  0x36   : > { %s1364_s16 = smov 128   ;;  %s1365_s19 = smov 8  }
  0x37   : > { %1054 = dma.hbm_to_vmem [thread:$0]  (!%p1488_p0), %s1796_s0, 256, %s235_s17, [#allocation3], %s1364_s16, %s1364_s16, %s1365_s19  }
  0x38   : > { %p1797_p4 = scmp.ne.s32.totalorder %s1789_s11, 0  ;;  %p1798_p7 = scmp.lt.s32.totalorder %s1361_s27, 2 }
  0x39   : > { %s261_s23 = sand.u32 1, %s1361_s27   ;;  %s263_s29 = sand.u32 1, %s1357_s26  }
  0x3a   : > { %p1520_p1 = pnand %p1798_p7, %p1797_p4  ;;  %s1526_s8 = sshll.u32 %s263_s29, 6 }
  0x3b   : > { %s1775_s9 = sshll.u32 %s1361_s27, 10  ;;  %s1800_s2 = sld [smem:[#allocation23_spill]] }
  0x3c   : > { %s1799_s22 = scalar_select %p1520_p1, 1, 0 }
  0x3d   : > { %s265_s11 = scalar_lea.vmem [#allocation7], %s1526_s8  ;;  %s1539_s16 = scalar_lea.sflag [#allocation3], %s261_s23 }
  0x3e   : > { %s272_s17 = sshll.u32 %s265_s11, 4  ;;  %p1780_p6 = pneg %p1520_p1  ;;  %s1537_s17 = int_to_ptr.vmem [resolvable:$true] %s272_s17 }
  0x41   : > { %s1534_s20 = scalar_lea.hbm %s1800_s2, %s1775_s9  ;;  %s1174_s21 = scalar_lea.hbm %s1800_s2, 2048 }
  0x42   : > { %s1169_s19 = scalar_lea.hbm %s1534_s20, 1024  ;;  %p1175_p13 = scmp.lt.u32.totalorder %s1534_s20, %s1800_s2 }
  0x43   : > { %p1170_p5 = scmp.ne.s32.totalorder %s1534_s20, %s1169_s19  ;;  %p1176_p3 = scmp.lt.u32.totalorder %s1174_s21, %s1169_s19 }
  0x44   : > { %p1178_p9 = scmp.lt.u32.totalorder %s1169_s19, %s1534_s20 }
  0x45   : > { %p1172_p11 = pnand %p1780_p6, %p1170_p5  ;;  %p1177_p8 = por %p1176_p3, %p1175_p13 }
  0x47   : > { %p1173_p12 = pneg %p1172_p11  ;;  %p1179_p2 = por %p1178_p9, %p1177_p8 }
  0x49   : > { %p1180_p4 = pnand %p1179_p2, %p1173_p12 }
  0x4b   : > { %1183 = shalt.err (!%p1180_p4)
}
  0x4c   : > { %s1184_s23 = scalar_lea.vmem %s1537_s17, 1024  ;;  %s1366_s11 = smov [#allocation7]  }
  0x4d   : > { %p1185_p7 = scmp.ne.s32.totalorder %s1537_s17, %s1184_s23  ;;  %s1189_s30 = sshll.u32 %s1366_s11, 4  ;;  %s1190_s30 = int_to_ptr.vmem [resolvable:$false] %s1189_s30 }
  0x4e   : > { %s1191_s9 = scalar_lea.vmem %s1190_s30, 2048  ;;  %p1192_p10 = scmp.lt.s32.totalorder %s1537_s17, %s1190_s30 }
  0x4f   : > { %p1187_p5 = pnand %p1185_p7, %p1780_p6  ;;  %p1193_p13 = scmp.lt.s32.totalorder %s1191_s9, %s1184_s23 }
  0x51   : > { %p1188_p11 = pneg %p1187_p5  ;;  %p1194_p3 = por %p1193_p13, %p1192_p10 }
  0x53   : > { %p1195_p8 = pnand %p1194_p3, %p1188_p11 }
  0x55   : > { %1198 = shalt.err (!%p1195_p8)
}
  0x56   : > { %s1367_s19 = smov 64   ;;  %s1368_s10 = smov 4  }
  0x57   : > { %1061 = dma.hbm_to_vmem [thread:$0]  (!%p1520_p1), %s1534_s20, 1024, %s1537_s17, %s1539_s16, %s1367_s19, %s1367_s19, %s1368_s10  }
  0x58   : > { %s1369_s21 = smov [#allocation5]   ;;  %s1801_s23 = sshll.u32 %s1361_s27, 10 }
  0x59   : > { %s247_s29 = sshll.u32 %s1369_s21, 4  ;;  %s1575_s9 = scalar_lea.hbm %s1763_s3, %s1801_s23  ;;  %s248_s29 = int_to_ptr.vmem [resolvable:$true] %s247_s29 }
  0x5a   : > { %s1199_s26 = scalar_lea.hbm %s1761_s1, 128  ;;  %p1802_p12 = pneg %p1488_p0 }
  0x5b   : > { %p1200_p10 = scmp.ne.s32.totalorder %s1761_s1, %s1199_s26  ;;  %p1206_p4 = scmp.lt.u32.totalorder %s1199_s26, %s1761_s1 }
  0x5d   : > { %p1202_p9 = pnand %p1200_p10, %p1802_p12 }
  0x5f   : > { %p1203_p2 = pneg %p1202_p9 }
  0x61   : > { %p1208_p7 = pnand %p1206_p4, %p1203_p2 }
  0x63   : > { %1211 = shalt.err (!%p1208_p7)
}
  0x64   : > { %s1212_s21 = scalar_lea.vmem %s248_s29, 128  ;;  %p1803_p11 = pmov %p1802_p12 }
  0x65   : > { %p1213_p5 = scmp.ne.s32.totalorder %s248_s29, %s1212_s21  ;;  %p1220_p8 = scmp.lt.s32.totalorder %s248_s29, %s248_s29 }
  0x66   : > { %p1221_p6 = scmp.lt.s32.totalorder %s1212_s21, %s1212_s21 }
  0x67   : > { %p1215_p13 = pnand %p1213_p5, %p1803_p11 }
  0x68   : > { %p1222_p1 = por %p1221_p6, %p1220_p8 }
  0x69   : > { %p1216_p3 = pneg %p1215_p13 }
  0x6b   : > { %p1223_p10 = pnand %p1222_p1, %p1216_p3 }
  0x6d   : > { %1226 = shalt.err (!%p1223_p10)
}
  0x6e   : > { %1057 = dma.hbm_to_vmem [thread:$0]  (!%p1488_p0), %s1761_s1, 128, %s248_s29, [#allocation6], %s1367_s19, %s1367_s19, %s1368_s10  }
  0x6f   : > { %s286_s24 = scalar_lea.vmem [#allocation8], %s1526_s8  ;;  %s1227_s14 = scalar_lea.hbm %s1575_s9, 1024 }
  0x70   : > { %s293_s26 = sshll.u32 %s286_s24, 4  ;;  %p1228_p1 = scmp.ne.s32.totalorder %s1575_s9, %s1227_s14  ;;  %s1601_s26 = int_to_ptr.vmem [resolvable:$true] %s293_s26 }
  0x71   : > { %p1804_p6 = scmp.ne.s32.totalorder %s1799_s22, 0  ;;  %s1232_s11 = scalar_lea.hbm %s1763_s3, 2048 }
  0x72   : > { %p1233_p4 = scmp.lt.u32.totalorder %s1575_s9, %s1763_s3  ;;  %p1234_p7 = scmp.lt.u32.totalorder %s1232_s11, %s1227_s14 }
  0x73   : > { %p1805_p12 = pneg %p1804_p6  ;;  %p1236_p5 = scmp.lt.u32.totalorder %s1227_s14, %s1575_s9 }
  0x74   : > { %p1235_p0 = por %p1234_p7, %p1233_p4 }
  0x75   : > { %p1230_p9 = pnand %p1228_p1, %p1805_p12 }
  0x76   : > { %p1237_p11 = por %p1236_p5, %p1235_p0 }
  0x77   : > { %p1231_p2 = pneg %p1230_p9 }
  0x79   : > { %p1238_p13 = pnand %p1237_p11, %p1231_p2 }
  0x7b   : > { %1241 = shalt.err (!%p1238_p13)
}
  0x7c   : > { %s1242_s8 = scalar_lea.vmem %s1601_s26, 1024  ;;  %p1806_p8 = pmov %p1805_p12 }
  0x7d   : > { %p1243_p3 = scmp.ne.s32.totalorder %s1601_s26, %s1242_s8  ;;  %s1370_s29 = smov [#allocation8]  }
  0x7e   : > { %s1247_s17 = sshll.u32 %s1370_s29, 4  ;;  %s1248_s17 = int_to_ptr.vmem [resolvable:$false] %s1247_s17 }
  0x7f   : > { %p1245_p10 = pnand %p1243_p3, %p1806_p8  ;;  %s1249_s21 = scalar_lea.vmem %s1248_s17, 2048 }
  0x80   : > { %p1250_p12 = scmp.lt.s32.totalorder %s1601_s26, %s1248_s17  ;;  %p1251_p9 = scmp.lt.s32.totalorder %s1249_s21, %s1242_s8 }
  0x81   : > { %p1246_p1 = pneg %p1245_p10 }
  0x82   : > { %p1252_p4 = por %p1251_p9, %p1250_p12 }
  0x84   : > { %p1253_p7 = pnand %p1252_p4, %p1246_p1 }
  0x86   : > { %1256 = shalt.err (!%p1253_p7)
}
  0x87   : > { %1064 = dma.hbm_to_vmem [thread:$0]  (!%p1804_p6), %s1575_s9, 1024, %s1601_s26, %s1539_s16, %s1367_s19, %s1367_s19, %s1368_s10  }
  0x88   : > { %p1807_p2 = scmp.ne.s32.totalorder %s1794_s15, 0 }
  0x89   : > { %p1808_p0 = scmp.eq.s32.totalorder (!%p1807_p2), %s1438_s28, 0 }
  0x8a   : > { %319 = sbr.rel (%p1807_p2) target bundleno = 980 (0x3d4), region = 44 }
  0x91   : > { %1328 = dma.done.wait (%p1808_p0), [#allocation3], 256   ;;  %p1809_p5 = pmov %p1808_p0 }
  0x92   : > { %p1810_p11 = pmov %p1808_p0 }
  0x93   : > { %1330 = vsyncadd (%p1809_p5), [#allocation3], 4294967040 }
  0x94   : > { %1332 = dma.done.wait (%p1810_p11), [#allocation6], 128   ;;  %p1811_p13 = pmov %p1808_p0 }
  0x95   : > { %s329_s22 = sand.u32 1, %s1438_s28   ;;  %s1642_s16 = sand.u32 1, %s1353_s25  }
  0x96   : > { %1334 = vsyncadd (%p1811_p13), [#allocation6], 4294967168  ;;  %s937_s15 = sshll.u32 %s1642_s16, 6  ;;  %s330_s19 = scalar_lea.sflag [#allocation3], %s329_s22 }
  0x97   : > { %s1645_s10 = scalar_lea.vmem [#allocation7], %s937_s15  ;;  %p1812_p6 = scmp.ne.s32.totalorder %s1790_s12, 0 }
  0x99   : > { %1336 = dma.done.wait (%p1812_p6), %s330_s19, 2048  }
  0x9a   : > { %1338 = vsyncadd (%p1812_p6), %s330_s19, 4294965248  ;;  %p385_p3 = scmp.lt.s32.totalorder %s1438_s28, 1  ;;  %s1663_s11 = scalar_lea.vmem [#allocation8], %s937_s15 }
  0x9b   : > { %s384_s12 = scalar_lea.vmem [#allocation10], %s1642_s16  ;;  %p1813_p8 = scmp.ne.s32.totalorder %s1438_s28, 0 }
  0x9c   : > { %s386_s9 = scalar_select %p385_p3, %s1438_s28, 1 }
  0x9d   : > { %397 = sbr.rel (%p1813_p8) target bundleno = 164 (0xa4), region = 64  ;;  %v398_v0 = vld [vmem:[#allocation2] sm:$0xff] (!%p1813_p8)  ;;  %v399_v1 = vld [vmem:[#allocation2 + $0x8] sm:$0xff] (!%p1813_p8) }
  0x9e   : > { %s939_s0 = sshll.u32 %s386_s9, 1  ;;  %400 = vst [vmem:[#allocation9] sm:$0xff] (!%p1813_p8), %v398_v0  ;;  %401 = vst [vmem:[#allocation9 + $0x8] sm:$0xff] (!%p1813_p8), %v399_v1 }
  0x9f   : > { %s1656_s26 = scalar_lea.vmem %s1764_s4, %s939_s0  ;;  %s1661_s23 = scalar_lea.vmem %s1765_s5, %s939_s0 }
  0xa4 PF: > { %v1371_v4 = vmov 0.0   ;;  %vm1372_vm0 = vmmov 0   ;;  %v1120_v6 = vld [vmem:[#allocation5] sm:$0xff]   ;;  %v1121_v7 = vld [vmem:[%s1645_s10] sm:$0xff]   ;;  %vm412_vm1 = vcmask 130048   ;;  %v1122_v8 = vld [vmem:[%s1645_s10 + $0x8] sm:$0xff]   ;;  %v587_v53 = vlaneseq }
  0xa5   : > { %v402_v2 = vld [vmem:[#allocation9] sm:$0xff]  ;;  %v403_v3 = vld [vmem:[#allocation9 + $0x8] sm:$0xff]  ;;  %987 = vmatprep.subr.bf16.mxu0 %v1371_v4  ;;  %989 = vmatprep.mubr.msk.bf16.mxu0 %vm1372_vm0, %v1371_v4  ;;  %v1123_v9 = vld [vmem:[%s1645_s10 + $0x10] sm:$0xff]   ;;  %s1373_s30 = smov [#allocation9]   ;;  %p1814_p1 = scmp.eq.s32.totalorder %s1438_s28, 1 }
  0xa6   : > { %v406_v5 = vpack.c.bf16 %v403_v3, %v402_v2  ;;  %993 = vmatprep.subr.bf16.mxu1 %v1371_v4  ;;  %1009 = vmatprep.mubr.msk.bf16.mxu1 %vm1372_vm0, %v1371_v4  ;;  %v1124_v10 = vld [vmem:[%s1645_s10 + $0x18] sm:$0xff]   ;;  %v1125_v11 = vld [vmem:[%s1645_s10 + $0x20] sm:$0xff]   ;;  %v1126_v12 = vld [vmem:[%s1645_s10 + $0x28] sm:$0xff]   ;;  %v588_v54 = vshrl.u32 %v587_v53, 7  ;;  %s765_s20 = sshll.u32 %s1373_s30, 4  ;;  %s766_s20 = int_to_ptr.vmem [resolvable:$true] %s765_s20 }
  0xa7   : > { %994 = vmatpush3.bf16.msra.mxu1 %v1121_v7  ;;  %v1127_v13 = vld [vmem:[%s1645_s10 + $0x30] sm:$0xff]   ;;  %v1128_v14 = vld [vmem:[%s1645_s10 + $0x38] sm:$0xff]   ;;  %v1129_v20 = vld [vmem:[%s1663_s11] sm:$0xff]   ;;  %s1257_s8 = scalar_lea.vmem %s766_s20, 256  ;;  %p1264_p4 = scmp.lt.s32.totalorder %s766_s20, %s766_s20 }
  0xa8   : > { %988 = vmatpush3.bf16.msra.mxu0 %v406_v5  ;;  %995 = vmatprep.subr.bf16.mxu1 %v1371_v4  ;;  %v1130_v21 = vld [vmem:[%s1663_s11 + $0x8] sm:$0xff]   ;;  %v1131_v22 = vld [vmem:[%s1663_s11 + $0x10] sm:$0xff]   ;;  %v1132_v23 = vld [vmem:[%s1663_s11 + $0x18] sm:$0xff]   ;;  %v589_v56 = vsub.s32 0, %v588_v54  ;;  %v595_v57 = vsub.s32 1, %v588_v54  ;;  %p1258_p10 = scmp.ne.s32.totalorder %s766_s20, %s1257_s8  ;;  %p1265_p7 = scmp.lt.s32.totalorder %s1257_s8, %s1257_s8 }
  0xa9   : > { %1013 = vmatprep.subr.bf16.mxu0 %v1371_v4  ;;  %v1133_v24 = vld [vmem:[%s1663_s11 + $0x20] sm:$0xff]   ;;  %v1134_v25 = vld [vmem:[%s1663_s11 + $0x28] sm:$0xff]   ;;  %v1135_v26 = vld [vmem:[%s1663_s11 + $0x30] sm:$0xff]  }
  0xaa   : > { %v1136_v27 = vld [vmem:[%s1663_s11 + $0x38] sm:$0xff]   ;;  %v563_v55 = vld [vmem:[%s1656_s26] sm:$0x3]  ;;  %p1259_p12 = pnand %p1258_p10, %p1814_p1  ;;  %p1266_p2 = por %p1265_p7, %p1264_p4 }
  0xab   : > { %990 = vmatmul.mubr.msk.bf16.vlgmr.msra.gmra.mrb[0].mxu0 %vm412_vm1, %v1120_v6  ;;  %996 = vmatpush3.bf16.msra.mxu1 %v1122_v8  ;;  %v596_v61 = vrot.slane %v563_v55, %v595_v57 }
  0xac   : > { %1029 = vmatprep.mubr.msk.bf16.mxu0 %vm1372_vm0, %v1371_v4  ;;  %997 = vmatprep.subr.bf16.mxu1 %v1371_v4  ;;  %p1260_p9 = pneg %p1259_p12 }
  0xad   : > { %1014 = vmatpush3.bf16.msra.mxu0 %v1129_v20 }
  0xae   : > { %1015 = vmatprep.subr.bf16.mxu0 %v1371_v4  ;;  %p1267_p0 = pnand %p1266_p2, %p1260_p9 }
  0xaf   : > { %998 = vmatpush3.bf16.msra.mxu1 %v1123_v9 }
  0xb0   : > { %999 = vmatprep.subr.bf16.mxu1 %v1371_v4 }
  0xb1   : > { %1016 = vmatpush3.bf16.msra.mxu0 %v1130_v21 }
  0xb2   : > { %1017 = vmatprep.subr.bf16.mxu0 %v1371_v4 }
  0xb3   : > { %1000 = vmatpush3.bf16.msra.mxu1 %v1124_v10 }
  0xb4   : > { %1001 = vmatprep.subr.bf16.mxu1 %v1371_v4 }
  0xb5   : > { %1018 = vmatpush3.bf16.msra.mxu0 %v1131_v22 }
  0xb6   : > { %1019 = vmatprep.subr.bf16.mxu0 %v1371_v4 }
  0xb7   : > { %1002 = vmatpush3.bf16.msra.mxu1 %v1125_v11 }
  0xb8   : > { %1003 = vmatprep.subr.bf16.mxu1 %v1371_v4 }
  0xb9   : > { %1020 = vmatpush3.bf16.msra.mxu0 %v1132_v23 }
  0xba   : > { %1021 = vmatprep.subr.bf16.mxu0 %v1371_v4 }
  0xbb   : > { %1004 = vmatpush3.bf16.msra.mxu1 %v1126_v12 }
  0xbc   : > { %1005 = vmatprep.subr.bf16.mxu1 %v1371_v4 }
  0xbd   : > { %1022 = vmatpush3.bf16.msra.mxu0 %v1133_v24 }
  0xbe   : > { %1023 = vmatprep.subr.bf16.mxu0 %v1371_v4 }
  0xbf   : > { %1006 = vmatpush3.bf16.msra.mxu1 %v1127_v13 }
  0xc0   : > { %1007 = vmatprep.subr.bf16.mxu1 %v1371_v4 }
  0xc1   : > { %1024 = vmatpush3.bf16.msra.mxu0 %v1134_v25 }
  0xc2   : > { %1025 = vmatprep.subr.bf16.mxu0 %v1371_v4 }
  0xc3   : > { %1008 = vmatpush3.bf16.msra.mxu1 %v1128_v14 }
  0xc5   : > { %1026 = vmatpush3.bf16.msra.mxu0 %v1135_v26 }
  0xc6   : > { %1027 = vmatprep.subr.bf16.mxu0 %v1371_v4 }
  0xc9   : > { %1028 = vmatpush3.bf16.msra.mxu0 %v1136_v27 }
 0x17e   : > { %v450_v15 = vpop.f32.mrb[0].mxu0 }
 0x17f   : > { %v991_v16 = vpop.f32.mrb[1].mxu0 }
 0x180   : > { %v453_v17 = vpop.f32.mrb[2].mxu0 }
 0x181   : > { %v457_v18 = vpack.c.bf16 %v453_v17, %v450_v15  ;;  %v992_v19 = vpop.f32.mrb[3].mxu0 }
 0x183   : > { %1010 = vmatmul.mubr.bf16.vlgmr.msra.gmra.mrb[0].mxu1 %v457_v18 }
 0x256   : > { %v556_v28 = vpop.f32.mrb[0].mxu1 }
 0x257   : > { %v1011_v29 = vpop.f32.mrb[1].mxu1 }
 0x258   : > { %v559_v30 = vpop.f32.mrb[2].mxu1 }
 0x259   : > { %v564_v31 = vadd.f32 %v559_v30, %v556_v28  ;;  %v1012_v32 = vpop.f32.mrb[3].mxu1 }
 0x25b   : > { %v565_v33 = vrot.slane %v564_v31, 4 }
 0x25d   : > { %v566_v34 = vadd.f32 %v565_v33, %v564_v31 }
 0x25f   : > { %v567_v35 = vrot.slane %v566_v34, 2 }
 0x261   : > { %v568_v36 = vadd.f32 %v567_v35, %v566_v34 }
 0x263   : > { %v569_v37 = vrot.slane %v568_v36, 1 }
 0x265   : > { %v570_v38 = vadd.f32 %v569_v37, %v568_v36 }
 0x267   : > { %v571_v39 = vmul.f32 0.0625, %v570_v38 }
 0x269   : > { %v572_v40 = vsub.f32 %v556_v28, %v571_v39  ;;  %v573_v41 = vsub.f32 %v559_v30, %v571_v39  ;;  %v707_v30 = vld [vmem:[%s1661_s23] sm:$0x3] }
 0x26a   : > { %v740_v34 = vrot.slane %v707_v30, %v595_v57 }
 0x26b   : > { %v574_v42 = vmul.f32 %v572_v40, %v572_v40  ;;  %v575_v43 = vmul.f32 %v573_v41, %v573_v41 }
 0x26d   : > { %v576_v44 = vadd.f32 %v575_v43, %v574_v42 }
 0x26f   : > { %v577_v45 = vrot.slane %v576_v44, 4 }
 0x271   : > { %v578_v46 = vadd.f32 %v577_v45, %v576_v44 }
 0x273   : > { %v579_v47 = vrot.slane %v578_v46, 2 }
 0x275   : > { %v580_v48 = vadd.f32 %v579_v47, %v578_v46 }
 0x277   : > { %v581_v49 = vrot.slane %v580_v48, 1 }
 0x279   : > { %v582_v50 = vadd.f32 %v581_v49, %v580_v48 }
 0x27b   : > { %v583_v51 = vmul.f32 0.0625, %v582_v50 }
 0x27d   : > { %v584_v52 = vadd.f32 1e-05, %v583_v51 }
 0x27f   : > { %1137 = vrsqrt.f32 %v584_v52 }
 0x289   : > { %v1138_v58 = vpop.eup %1137 }
 0x28a   : > { %v586_v59 = vmul.f32 %v1138_v58, %v563_v55 }
 0x28c   : > { %v590_v60 = vrot.slane %v586_v59, %v589_v56 }
 0x28e   : > { %v591_v62 = vmul.f32 %v590_v60, %v572_v40  ;;  %v592_v63 = vmul.f32 %v590_v60, %v573_v41 }
 0x290   : > { %v597_v0 = vadd.f32 %v596_v61, %v591_v62  ;;  %v598_v1 = vadd.f32 %v596_v61, %v592_v63 }
 0x292   : > { %v600_v2 = vmax.f32 %v598_v1, 0.0  ;;  %v599_v3 = vmax.f32 %v597_v0, 0.0 }
 0x294   : > { %v601_v4 = vpack.c.bf16 %v600_v2, %v599_v3 }
 0x296   : > { %1030 = vmatmul.mubr.bf16.vlgmr.msra.gmra.mrb[4].mxu0 %v601_v4 }
 0x369   : > { %v700_v5 = vpop.f32.mrb[4].mxu0 }
 0x36a   : > { %v1031_v6 = vpop.f32.mrb[5].mxu0 }
 0x36b   : > { %v703_v7 = vpop.f32.mrb[6].mxu0 }
 0x36c   : > { %v708_v8 = vadd.f32 %v703_v7, %v700_v5  ;;  %v1032_v9 = vpop.f32.mrb[7].mxu0 }
 0x36e   : > { %v709_v10 = vrot.slane %v708_v8, 4 }
 0x370   : > { %v710_v11 = vadd.f32 %v709_v10, %v708_v8 }
 0x372   : > { %v711_v12 = vrot.slane %v710_v11, 2 }
 0x374   : > { %v712_v13 = vadd.f32 %v711_v12, %v710_v11 }
 0x376   : > { %v713_v14 = vrot.slane %v712_v13, 1 }
 0x378   : > { %v714_v15 = vadd.f32 %v713_v14, %v712_v13 }
 0x37a   : > { %v715_v16 = vmul.f32 0.0625, %v714_v15 }
 0x37c   : > { %v716_v17 = vsub.f32 %v700_v5, %v715_v16  ;;  %v717_v18 = vsub.f32 %v703_v7, %v715_v16 }
 0x37e   : > { %v718_v19 = vmul.f32 %v716_v17, %v716_v17  ;;  %v719_v20 = vmul.f32 %v717_v18, %v717_v18 }
 0x380   : > { %v720_v21 = vadd.f32 %v719_v20, %v718_v19 }
 0x382   : > { %v721_v22 = vrot.slane %v720_v21, 4 }
 0x384   : > { %v722_v23 = vadd.f32 %v721_v22, %v720_v21 }
 0x386   : > { %v723_v24 = vrot.slane %v722_v23, 2 }
 0x388   : > { %v724_v25 = vadd.f32 %v723_v24, %v722_v23 }
 0x38a   : > { %v725_v26 = vrot.slane %v724_v25, 1 }
 0x38c   : > { %v726_v27 = vadd.f32 %v725_v26, %v724_v25 }
 0x38e   : > { %v727_v28 = vmul.f32 0.0625, %v726_v27 }
 0x390   : > { %v728_v29 = vadd.f32 1e-05, %v727_v28 }
 0x392   : > { %1139 = vrsqrt.f32 %v728_v29 }
 0x39c   : > { %v1140_v31 = vpop.eup %1139 }
 0x39d   : > { %v730_v32 = vmul.f32 %v1140_v31, %v707_v30 }
 0x39f   : > { %v734_v33 = vrot.slane %v730_v32, %v589_v56 }
 0x3a1   : > { %v735_v35 = vmul.f32 %v734_v33, %v716_v17  ;;  %v736_v36 = vmul.f32 %v734_v33, %v717_v18 }
 0x3a3   : > { %v742_v37 = vadd.f32 %v740_v34, %v736_v36  ;;  %v741_v38 = vadd.f32 %v740_v34, %v735_v35 }
 0x3a5   : > { %v744_v39 = vmax.f32 %v742_v37, 0.0  ;;  %v743_v40 = vmax.f32 %v741_v38, 0.0 }
 0x3a7   : > { %746 = vst [vmem:[#allocation9 + $0x8] sm:$0xff] %v744_v39  ;;  %745 = vst [vmem:[#allocation9] sm:$0xff] %v743_v40  ;;  %v747_v41 = vadd.f32 %v744_v39, %v743_v40 }
 0x3a8   : > { %1270 = shalt.err (!%p1267_p0)
}
 0x3a9   : > { %s1271_s21 = scalar_lea.hbm %s1766_s6, 256  ;;  %p1815_p11 = pmov %p1814_p1 }
 0x3aa   : > { %p1272_p5 = scmp.ne.s32.totalorder %s1766_s6, %s1271_s21  ;;  %p1277_p3 = scmp.lt.u32.totalorder %s1271_s21, %s1766_s6 }
 0x3ac   : > { %p1273_p13 = pnand %p1272_p5, %p1815_p11 }
 0x3ae   : > { %p1274_p6 = pneg %p1273_p13 }
 0x3b0   : > { %p1279_p8 = pnand %p1277_p3, %p1274_p6 }
 0x3b2   : > { %1282 = shalt.err (!%p1279_p8)
}
 0x3b3   : > { %s1374_s9 = smov 128   ;;  %s1375_s0 = smov 8   ;;  %v748_v42 = vrot.slane %v747_v41, 4 }
 0x3b4   : > { %p1816_p10 = pmov %p1814_p1  ;;  %s961_s26 = sshll.u32 %s1438_s28, 4 }
 0x3b5   : > { %v749_v43 = vadd.f32 %v748_v42, %v747_v41  ;;  %s781_s14 = sshll.u32 %s384_s12, 4  ;;  %s1710_s11 = scalar_lea.hbm %s1767_s7, %s961_s26  ;;  %s1712_s14 = int_to_ptr.vmem [resolvable:$true] %s781_s14 }
 0x3b6   : > { %1046 = dma.vmem_to_hbm [thread:$0]  (%p1816_p10), %s766_s20, 256, %s1766_s6, [#allocation4], %s1374_s9, %s1374_s9, %s1375_s0  }
 0x3b7   : > { %v750_v44 = vrot.slane %v749_v43, 2  ;;  %s756_s30 = scalar_lea.sflag [#allocation11], %s1642_s16  ;;  %s1283_s20 = scalar_lea.vmem %s1712_s14, 16 }
 0x3b8   : > { %p1284_p1 = scmp.ne.s32.totalorder %s1712_s14, %s1283_s20  ;;  %p1817_p12 = scmp.ne.s32.totalorder %s1791_s13, 0 }
 0x3b9   : > { %v751_v45 = vadd.f32 %v750_v44, %v749_v43  ;;  %s1376_s8 = smov [#allocation10]  }
 0x3ba   : > { %p1285_p9 = pnand %p1284_p1, %p1817_p12  ;;  %s1287_s29 = sshll.u32 %s1376_s8, 4  ;;  %s1288_s29 = int_to_ptr.vmem [resolvable:$false] %s1287_s29 }
 0x3bb   : > { %v752_v46 = vrot.slane %v751_v45, 1  ;;  %s1289_s17 = scalar_lea.vmem %s1288_s29, 32  ;;  %p1290_p7 = scmp.lt.s32.totalorder %s1712_s14, %s1288_s29 }
 0x3bc   : > { %p1286_p4 = pneg %p1285_p9  ;;  %p1291_p2 = scmp.lt.s32.totalorder %s1289_s17, %s1283_s20 }
 0x3bd   : > { %v753_v47 = vadd.f32 %v752_v46, %v751_v45 }
 0x3be   : > { %p1292_p0 = por %p1291_p2, %p1290_p7 }
 0x3bf   : > { %754 = vst [vmem:[%s384_s12] sm:$0x1] %v753_v47 }
 0x3c0   : > { %p1293_p5 = pnand %p1292_p0, %p1286_p4 }
 0x3c2   : > { %1296 = shalt.err (!%p1293_p5)
}
 0x3c3   : > { %s1297_s16 = scalar_lea.hbm %s1710_s11, 16  ;;  %s1301_s22 = scalar_lea.hbm %s1767_s7, 32 }
 0x3c4   : > { %p1298_p11 = scmp.ne.s32.totalorder %s1710_s11, %s1297_s16  ;;  %p1302_p3 = scmp.lt.u32.totalorder %s1710_s11, %s1767_s7 }
 0x3c5   : > { %p1303_p8 = scmp.lt.u32.totalorder %s1301_s22, %s1297_s16  ;;  %p1305_p1 = scmp.lt.u32.totalorder %s1297_s16, %s1710_s11 }
 0x3c6   : > { %p1299_p13 = pnand %p1298_p11, %p1817_p12 }
 0x3c7   : > { %p1304_p10 = por %p1303_p8, %p1302_p3 }
 0x3c8   : > { %p1300_p6 = pneg %p1299_p13 }
 0x3c9   : > { %p1306_p9 = por %p1305_p1, %p1304_p10 }
 0x3cb   : > { %p1307_p4 = pnand %p1306_p9, %p1300_p6 }
 0x3cd   : > { %1310 = shalt.err (!%p1307_p4)
}
 0x3ce   : > { %1047 = dma.vmem_to_hbm [thread:$0]  (%p1817_p12), %s1712_s14, 16, %s1710_s11, %s756_s30  }
 0x3cf   : > { %p1818_p7 = scmp.eq.s32.totalorder %s1438_s28, 1 }
 0x3d1   : > { %1340 = dma.done.wait (%p1818_p7), [#allocation4], 256   ;;  %p1819_p2 = pmov %p1818_p7 }
 0x3d3   : > { %1342 = vsyncadd (%p1819_p2), [#allocation4], 4294967040 }
 0x3d4 PF: > { %s1820_s10 = sld [smem:[#allocation17_spill]]  ;;  %s1821_s9 = sld [smem:[#allocation21_spill]] }
 0x3d5   : > { %p1823_p5 = scmp.ge.s32.totalorder %s1361_s27, 2 }
 0x3da   : > { %s797_s0 = sand.u32 1, %s1820_s10   ;;  %p1822_p0 = scmp.ne.s32.totalorder %s1821_s9, 0 }
 0x3db   : > { %s798_s2 = scalar_lea.sflag [#allocation11], %s797_s0 }
 0x3dc   : > { %p1066_p11 = pnand %p1823_p5, %p1822_p0 }
 0x3de   : > { %1344 = dma.done.wait (!%p1066_p11), %s798_s2, 16  }
 0x3df   : > { %1346 = vsyncadd (!%p1066_p11), %s798_s2, 4294967280  ;;  %s1824_s27 = sld [smem:[#allocation19_spill]]  ;;  %s1825_s13 = sld [smem:[#allocation18_spill]] }
 0x3e0   : > { %s1826_s26 = sld [smem:[#allocation20_spill]]  ;;  %s1827_s24 = smov %s1353_s25 }
 0x3e5   : > { %p21_p12 = scmp.ge.s32.totalorder %s1824_s27, 4   ;;  %s1828_s25 = smov %s1825_s13 }
 0x3e7   :  { %23 = sbr.rel (!%p21_p12) target bundleno = 9 (0x9), region = 126 }
 0x3ee   :  { %802 = vsyncpa [#allocation3], 1 }
 0x3ef   :  { %804 = vsyncpa [#allocation3 + $0x1], 1 }
 0x3f0   :  { %805 = vsyncpa [#allocation6], 1 }
 0x3f1   :  { %806 = vsyncpa [#allocation4], 1 }
 0x3f2   :  { %808 = vsyncpa [#allocation4 + $0x1], 1 }
 0x3f3   :  { %809 = vsyncpa [#allocation11], 1 }
 0x3f4   :  { %811 = vsyncpa [#allocation11 + $0x1], 1 }

</bundles_post_ra>
